<compile_context>
chip_gen: v7x
topology: tpu7x:2x2x1
jax: 0.10.0
libtpu: 0.0.40
codegen_flags: <defaults>
</compile_context>

<pallas_src>
import functools

import jax
import jax.numpy as jnp
from jax.experimental import pallas as pl
from jax.experimental.pallas import tpu as pltpu


def _round_up(x, m):
    return ((x + m - 1) // m) * m


# ---------------------------------------------------------------------------
# Fused kernel.  One grid step = one batch element.  All activations are
# (C, S) tiles with the flattened (padded) spatial axis S on lanes.
# ---------------------------------------------------------------------------
def _fused_kernel(*refs, wp, lp, use_mask):
    if use_mask:
        (x_ref, mask_ref, pre_ref, cell_ref,
         w1_ref, b1_ref, wdw_ref, b2_ref,
         wcomb_ref, wpre_ref, bcomb_ref, wg_ref, bg_ref,
         out_ref, newcell_ref, h1_s) = refs
    else:
        (x_ref, pre_ref, cell_ref,
         w1_ref, b1_ref, wdw_ref, b2_ref,
         wcomb_ref, wpre_ref, bcomb_ref, wg_ref, bg_ref,
         out_ref, newcell_ref, h1_s) = refs
        mask_ref = None

    f32 = jnp.float32
    bf16 = jnp.bfloat16

    # ---- 1x1 conv #1 (BN folded) + ReLU6 -----------------------------------
    x = x_ref[0]                                                  # (Cin, Sx) bf16
    h1 = jnp.dot(w1_ref[...], x, preferred_element_type=f32) + b1_ref[...]
    h1 = jnp.clip(h1, 0.0, 6.0)
    if use_mask:
        h1 = h1 * mask_ref[...]          # zero the conv_dw padding ring only
    # Full-width bf16 staging store (no tail zeroing needed: out-of-image
    # columns only feed anchors that are discarded on the host).
    h1_s[...] = h1.astype(bf16)                                   # (Cexp, Sx)

    # ---- depthwise 3x3 (BN folded) + ReLU6 on the flat spatial grid --------
    cexp_p = h1_s.shape[0]
    acc = jnp.zeros((cexp_p, lp), f32)
    for ky in range(3):
        for kx in range(3):
            shift = ky * wp + kx
            tap = h1_s[:, shift:shift + lp].astype(f32)           # (Cexp, Lp)
            acc = acc + tap * wdw_ref[:, ky * 3 + kx:ky * 3 + kx + 1]
    h2 = jnp.clip(acc + b2_ref[...], 0.0, 6.0).astype(bf16)       # (Cexp, Lp)

    # ---- bottleneck (second 1x1 conv folded into it on the host) -----------
    pre = pre_ref[0]                                              # (Oup, Lp) f32
    cell = cell_ref[0]
    merged = (jnp.dot(wcomb_ref[...], h2, preferred_element_type=f32)
              + jnp.dot(wpre_ref[...], pre.astype(bf16),
                        preferred_element_type=f32)
              + bcomb_ref[...])
    m16 = merged.astype(bf16)

    # ---- 4 gates in ONE stacked matmul; sublane slices are free views ------
    oup_p = out_ref.shape[1]
    gates = jnp.dot(wg_ref[...], m16, preferred_element_type=f32) + bg_ref[...]
    g_f = gates[0 * oup_p:1 * oup_p]      # forget     (bias already +1.0)
    g_ig = gates[1 * oup_p:2 * oup_p]     # inputgate
    g_ic = gates[2 * oup_p:3 * oup_p]     # input2cell
    g_og = gates[3 * oup_p:4 * oup_p]     # outputgate

    new_cell = (cell * jax.nn.sigmoid(g_f)
                + jnp.tanh(g_ic) * jax.nn.sigmoid(g_ig))
    out_ref[0] = jnp.tanh(new_cell) * jax.nn.sigmoid(g_og)
    newcell_ref[0] = new_cell


# ---------------------------------------------------------------------------
# Host-side helpers (cheap XLA glue: folds, pads, reshapes).
# ---------------------------------------------------------------------------
def _fold_bn(w, scale, shift):
    """Fold inference-mode BN scale/shift into conv weight / bias."""
    wf = w * scale.reshape((-1,) + (1,) * (w.ndim - 1))
    return wf.astype(jnp.float32), shift.reshape(-1, 1).astype(jnp.float32)


def _pad2(a, r, c):
    return jnp.pad(a, ((0, r - a.shape[0]), (0, c - a.shape[1])))


def _geometry(h, w, stride, padding):
    hp, wp = h + 2 * padding, w + 2 * padding
    sp = hp * wp
    ho = (hp - 3) // stride + 1
    wo = (wp - 3) // stride + 1
    rows = (ho - 1) * stride + 1
    lp = _round_up(rows * wp, 128)                     # lane-aligned anchor grid
    sx = _round_up(max(sp, lp + 2 * wp + 2), 128)      # staging / x width
    return hp, wp, sp, ho, wo, rows, lp, sx


def _embed_state(x4d, stride, rows, wp, wo, lp, c_pad):
    """(N, C, Ho, Wo) NCHW state -> flat anchor-grid layout (N, Cpad, Lp)."""
    n, c = x4d.shape[:2]
    grid = jnp.zeros((n, c_pad, rows, wp), jnp.float32)
    grid = grid.at[:, :c, ::stride, 0:(wo - 1) * stride + 1:stride].set(
        x4d.astype(jnp.float32))
    flat = grid.reshape(n, c_pad, rows * wp)
    if lp > rows * wp:
        flat = jnp.pad(flat, ((0, 0), (0, 0), (0, lp - rows * wp)))
    return flat


def _extract_state(flat, stride, rows, wp, ho, wo, c):
    """Flat anchor-grid (N, Cpad, Lp) -> (N, C, Ho, Wo) NCHW."""
    n = flat.shape[0]
    g = flat[:, :c, :rows * wp].reshape(n, c, rows, wp)
    return g[:, :, ::stride, 0:(wo - 1) * stride + 1:stride]


# ---------------------------------------------------------------------------
# Full forward.
# ---------------------------------------------------------------------------
def lstm_conv_dw_forward(params, x_nchw, state=None, conv_dw_stride=1,
                         conv_dw_padding=0, forget_bias=1.0):
    """Returns (output NCHW, new_state) with state = (pre_output, cell) NCHW."""
    n, cin, h, w = x_nchw.shape
    stride, pad = conv_dw_stride, conv_dw_padding
    cexp = params["w1"].shape[0]
    oup = params["w3"].shape[0]
    hp, wp, sp, ho, wo, rows, lp, sx = _geometry(h, w, stride, pad)
    cin_p = _round_up(cin, 16)        # bf16 RHS sublane packing
    cexp_p = _round_up(cexp, 16)      # bf16 sublane packing for h2 / w_comb
    oup_p = _round_up(oup, 8)         # f32 sublanes; free gate sublane slices
    use_mask = pad > 0

    # ---- parameter folding (BN + forget bias + conv2->bottleneck fold) -----
    w1f, b1 = _fold_bn(params["w1"], *params["bn1"])
    w1f = _pad2(w1f, cexp_p, cin_p).astype(jnp.bfloat16)
    b1 = _pad2(b1, cexp_p, 1)

    wdwf, b2 = _fold_bn(params["w_dw"].reshape(cexp, 9), *params["bn2"])
    wdwf = _pad2(wdwf, cexp_p, 9)                      # stays f32 (VPU path)
    b2 = _pad2(b2, cexp_p, 1)

    w3f, b3 = _fold_bn(params["w3"], *params["bn3"])
    wb = params["wb"].astype(jnp.float32)              # cat order: [input|pre]
    wb_in, wb_pre_raw = wb[:, :oup], wb[:, oup:]
    w_comb = _pad2(wb_in @ w3f, oup_p, cexp_p).astype(jnp.bfloat16)
    b_comb = _pad2(wb_in @ b3
                   + params["bb"].reshape(oup, 1).astype(jnp.float32), oup_p, 1)
    wb_pre = _pad2(wb_pre_raw, oup_p, oup_p).astype(jnp.bfloat16)

    def padg(name):
        return _pad2(params[name].astype(jnp.float32), oup_p, oup_p)

    def padb(name, add=0.0):
        return jnp.pad(params[name].astype(jnp.float32), (0, oup_p - oup)) + add

    # gate order: forget | inputgate | input2cell | outputgate
    wg_stacked = jnp.concatenate(
        [padg("wf"), padg("wig"), padg("wi2c"), padg("wog")],
        axis=0).astype(jnp.bfloat16)                   # (4*Oup, Oup)
    bg_stacked = jnp.concatenate(
        [padb("bf", forget_bias), padb("big"), padb("bi2c"), padb("bog")]
    ).reshape(4 * oup_p, 1)

    # ---- input / state staging ----------------------------------------------
    xf = x_nchw.astype(jnp.float32)
    if pad:
        xf = jnp.pad(xf, ((0, 0), (0, 0), (pad, pad), (pad, pad)))
    if cin_p != cin:
        xf = jnp.pad(xf, ((0, 0), (0, cin_p - cin), (0, 0), (0, 0)))
    x_flat = xf.reshape(n, cin_p, sp)
    if sx > sp:
        x_flat = jnp.pad(x_flat, ((0, 0), (0, 0), (0, sx - sp)))
    x_flat = x_flat.astype(jnp.bfloat16)               # halve HBM->VMEM bytes

    if use_mask:
        m2 = jnp.zeros((hp, wp), jnp.float32).at[pad:pad + h, pad:pad + w].set(1.0)
        mask = jnp.pad(m2.reshape(1, sp), ((0, 0), (0, sx - sp)))

    if state is None:   # init_cell_state: zeros of the conv_dw output shape
        pre_flat = jnp.zeros((n, oup_p, lp), jnp.float32)
        cell_flat = jnp.zeros((n, oup_p, lp), jnp.float32)
    else:
        pre_flat = _embed_state(state[0], stride, rows, wp, wo, lp, oup_p)
        cell_flat = _embed_state(state[1], stride, rows, wp, wo, lp, oup_p)

    # ---- single fused pallas_call over the batch ----------------------------
    kernel = functools.partial(_fused_kernel, wp=wp, lp=lp, use_mask=use_mask)
    bmap3 = lambda b: (b, 0, 0)
    wmap2 = lambda b: (0, 0)

    in_specs = [pl.BlockSpec((1, cin_p, sx), bmap3)]   # x (flattened spatial)
    inputs = [x_flat]
    if use_mask:
        in_specs.append(pl.BlockSpec((1, sx), wmap2))  # valid-image mask
        inputs.append(mask)
    state_base = len(inputs)
    in_specs += [
        pl.BlockSpec((1, oup_p, lp), bmap3),           # pre_output state
        pl.BlockSpec((1, oup_p, lp), bmap3),           # old cell state
        pl.BlockSpec((cexp_p, cin_p), wmap2),          # w1 (BN folded, bf16)
        pl.BlockSpec((cexp_p, 1), wmap2),              # b1
        pl.BlockSpec((cexp_p, 9), wmap2),              # depthwise w (BN folded)
        pl.BlockSpec((cexp_p, 1), wmap2),              # b2
        pl.BlockSpec((oup_p, cexp_p), wmap2),          # w_comb = wb_in @ w3
        pl.BlockSpec((oup_p, oup_p), wmap2),           # wb_pre
        pl.BlockSpec((oup_p, 1), wmap2),               # b_comb
        pl.BlockSpec((4 * oup_p, oup_p), wmap2),       # stacked gate weights
        pl.BlockSpec((4 * oup_p, 1), wmap2),           # stacked gate biases
    ]
    inputs += [pre_flat, cell_flat, w1f, b1, wdwf, b2,
               w_comb, wb_pre, b_comb, wg_stacked, bg_stacked]

    # Explicit VMEM budget (double-buffered IO + weights + scratch) + margin.
    io_bytes = 2 * (cin_p * sx * 2)                          # x (bf16)
    if use_mask:
        io_bytes += 2 * (sx * 4)
    io_bytes += 2 * 4 * (oup_p * lp * 4)                     # pre/cell/out/newcell
    w_bytes = 2 * (cexp_p * cin_p * 2 + cexp_p * 4 + cexp_p * 9 * 4 + cexp_p * 4
                   + oup_p * cexp_p * 2 + oup_p * oup_p * 2 + oup_p * 4
                   + 4 * oup_p * oup_p * 2 + 4 * oup_p * 4)
    scratch_bytes = cexp_p * sx * 2
    vmem_limit = int(min(max(2 * (io_bytes + w_bytes + scratch_bytes) + (4 << 20),
                             16 << 20), 64 << 20))

    out_flat, newcell_flat = pl.pallas_call(
        kernel,
        out_shape=(jax.ShapeDtypeStruct((n, oup_p, lp), jnp.float32),
                   jax.ShapeDtypeStruct((n, oup_p, lp), jnp.float32)),
        grid=(n,),
        in_specs=in_specs,
        out_specs=(pl.BlockSpec((1, oup_p, lp), bmap3),
                   pl.BlockSpec((1, oup_p, lp), bmap3)),
        scratch_shapes=[pltpu.VMEM((cexp_p, sx), jnp.bfloat16)],
        input_output_aliases={state_base: 0, state_base + 1: 1},
        compiler_params=pltpu.CompilerParams(
            dimension_semantics=("parallel",),         # batch across v7x cores
            vmem_limit_bytes=vmem_limit),
    )(*inputs)

    output = _extract_state(out_flat, stride, rows, wp, ho, wo, oup)
    new_cell = _extract_state(newcell_flat, stride, rows, wp, ho, wo, oup)
    return output, (output, new_cell)


# ---------------------------------------------------------------------------
# Deterministic synthetic parameters.
# ---------------------------------------------------------------------------
def _rand_bn(key, c, eps=1e-5):
    k1, k2, k3, k4 = jax.random.split(key, 4)
    gamma = 1.0 + 0.1 * jax.random.normal(k1, (c,), jnp.float32)
    beta = 0.1 * jax.random.normal(k2, (c,), jnp.float32)
    mean = 0.1 * jax.random.normal(k3, (c,), jnp.float32)
    var = 1.0 + 0.1 * jax.random.uniform(k4, (c,), jnp.float32)
    scale = gamma / jnp.sqrt(var + eps)
    shift = beta - mean * scale
    return scale, shift


def init_params(key, inp, oup, expand_ratio=1):
    cexp = oup * expand_ratio
    ks = jax.random.split(key, 16)
    p = {}
    p["w1"] = 0.2 * jax.random.normal(ks[0], (cexp, inp), jnp.float32)
    p["bn1"] = _rand_bn(ks[1], cexp)
    p["w_dw"] = 0.2 * jax.random.normal(ks[2], (cexp, 3, 3), jnp.float32)
    p["bn2"] = _rand_bn(ks[3], cexp)
    p["w3"] = 0.2 * jax.random.normal(ks[4], (oup, cexp), jnp.float32)
    p["bn3"] = _rand_bn(ks[5], oup)
    p["wb"] = 0.2 * jax.random.normal(ks[6], (oup, 2 * oup), jnp.float32)
    p["bb"] = 0.1 * jax.random.normal(ks[7], (oup,), jnp.float32)
    p["wf"] = 0.2 * jax.random.normal(ks[8], (oup, oup), jnp.float32)
    p["bf"] = 0.1 * jax.random.normal(ks[9], (oup,), jnp.float32)
    p["wig"] = 0.2 * jax.random.normal(ks[10], (oup, oup), jnp.float32)
    p["big"] = 0.1 * jax.random.normal(ks[11], (oup,), jnp.float32)
    p["wi2c"] = 0.2 * jax.random.normal(ks[12], (oup, oup), jnp.float32)
    p["bi2c"] = 0.1 * jax.random.normal(ks[13], (oup,), jnp.float32)
    p["wog"] = 0.2 * jax.random.normal(ks[14], (oup, oup), jnp.float32)
    p["bog"] = 0.1 * jax.random.normal(ks[15], (oup,), jnp.float32)
    return p


if __name__ == "__main__":
    key = jax.random.PRNGKey(0)
    k_param, k_x = jax.random.split(key)

    INP, OUP = 4, 8
    N, H, W = 2, 16, 16

    params = init_params(k_param, INP, OUP, expand_ratio=1)
    x = jax.random.normal(k_x, (N, INP, H, W), jnp.float32)

    fwd = jax.jit(functools.partial(lstm_conv_dw_forward,
                                    conv_dw_stride=1, conv_dw_padding=0))
    out, state = fwd(params, x)
    out = jax.block_until_ready(out)
    jax.block_until_ready(state)

    assert out.shape == (N, OUP, H - 2, W - 2), out.shape
    assert bool(jnp.all(jnp.isfinite(out)))

    # Second step: feed the returned state back in (recurrent path).
    out2, state2 = fwd(params, x, state)
    out2 = jax.block_until_ready(out2)
    jax.block_until_ready(state2)
    assert out2.shape == (N, OUP, H - 2, W - 2), out2.shape
    assert bool(jnp.all(jnp.isfinite(out2)))

    print("KERNEL_OK")
</pallas_src>

<mosaic_0001>
module attributes {stable_mosaic.version = 11 : i64} {
  func.func @_fused_kernel(%arg0: i32, %arg1: memref<1x16x384xbf16, #tpu.memory_space<vmem>>, %arg2: memref<1x8x256xf32, #tpu.memory_space<vmem>>, %arg3: memref<1x8x256xf32, #tpu.memory_space<vmem>>, %arg4: memref<16x16xbf16, #tpu.memory_space<vmem>>, %arg5: memref<16x1xf32, #tpu.memory_space<vmem>>, %arg6: memref<16x9xf32, #tpu.memory_space<vmem>>, %arg7: memref<16x1xf32, #tpu.memory_space<vmem>>, %arg8: memref<8x16xbf16, #tpu.memory_space<vmem>>, %arg9: memref<8x8xbf16, #tpu.memory_space<vmem>>, %arg10: memref<8x1xf32, #tpu.memory_space<vmem>>, %arg11: memref<32x8xbf16, #tpu.memory_space<vmem>>, %arg12: memref<32x1xf32, #tpu.memory_space<vmem>>, %arg13: memref<1x8x256xf32, #tpu.memory_space<vmem>>, %arg14: memref<1x8x256xf32, #tpu.memory_space<vmem>>, %arg15: memref<16x384xbf16, #tpu.memory_space<vmem>>) attributes {dimension_semantics = [#tpu.dimension_semantics<parallel>], iteration_bounds = array<i64: 2>, scalar_prefetch = 0 : i64, scratch_operands = 1 : i64, tpu.core_type = #tpu.core_type<tc>, window_params = [{transform_indices = @transform_0, window_bounds = array<i64: 1, 16, 384>}, {transform_indices = @transform_1, window_bounds = array<i64: 1, 8, 256>}, {transform_indices = @transform_2, window_bounds = array<i64: 1, 8, 256>}, {pipeline_mode = #tpu.pipeline_mode<synchronous>, transform_indices = @transform_3, window_bounds = array<i64: 16, 16>}, {pipeline_mode = #tpu.pipeline_mode<synchronous>, transform_indices = @transform_4, window_bounds = array<i64: 16, 1>}, {pipeline_mode = #tpu.pipeline_mode<synchronous>, transform_indices = @transform_5, window_bounds = array<i64: 16, 9>}, {pipeline_mode = #tpu.pipeline_mode<synchronous>, transform_indices = @transform_6, window_bounds = array<i64: 16, 1>}, {pipeline_mode = #tpu.pipeline_mode<synchronous>, transform_indices = @transform_7, window_bounds = array<i64: 8, 16>}, {pipeline_mode = #tpu.pipeline_mode<synchronous>, transform_indices = @transform_8, window_bounds = array<i64: 8, 8>}, {pipeline_mode = #tpu.pipeline_mode<synchronous>, transform_indices = @transform_9, window_bounds = array<i64: 8, 1>}, {pipeline_mode = #tpu.pipeline_mode<synchronous>, transform_indices = @transform_10, window_bounds = array<i64: 32, 8>}, {pipeline_mode = #tpu.pipeline_mode<synchronous>, transform_indices = @transform_11, window_bounds = array<i64: 32, 1>}, {transform_indices = @transform_12, window_bounds = array<i64: 1, 8, 256>}, {transform_indices = @transform_13, window_bounds = array<i64: 1, 8, 256>}]} {
    %c0 = arith.constant 0 : index
    %c0_0 = arith.constant 0 : index
    %c0_1 = arith.constant 0 : index
    %0 = vector.load %arg1[%c0, %c0_0, %c0_1] : memref<1x16x384xbf16, #tpu.memory_space<vmem>>, vector<1x16x384xbf16>
    %1 = vector.shape_cast %0 : vector<1x16x384xbf16> to vector<16x384xbf16>
    %c0_2 = arith.constant 0 : index
    %c0_3 = arith.constant 0 : index
    %2 = vector.load %arg4[%c0_2, %c0_3] : memref<16x16xbf16, #tpu.memory_space<vmem>>, vector<16x16xbf16>
    %cst = arith.constant dense<0.000000e+00> : vector<16x384xf32>
    %3 = tpu.matmul %2, %1, %cst {dimension_numbers = #tpu.dot_dimension_numbers<[1], [0], [0], [1], [0, 0, 1, 1], [], []>} : vector<16x16xbf16>, vector<16x384xbf16>, vector<16x384xf32> -> vector<16x384xf32>
    %c0_4 = arith.constant 0 : index
    %c0_5 = arith.constant 0 : index
    %4 = vector.load %arg5[%c0_4, %c0_5] : memref<16x1xf32, #tpu.memory_space<vmem>>, vector<16x1xf32>
    %5 = vector.broadcast %4 : vector<16x1xf32> to vector<16x384xf32>
    %6 = arith.addf %3, %5 : vector<16x384xf32>
    %cst_6 = arith.constant 0.000000e+00 : f32
    %cst_7 = arith.constant 6.000000e+00 : f32
    %7 = vector.broadcast %cst_6 : f32 to vector<16x384xf32>
    %8 = arith.maximumf %7, %6 : vector<16x384xf32>
    %9 = vector.broadcast %cst_7 : f32 to vector<16x384xf32>
    %10 = arith.minimumf %9, %8 : vector<16x384xf32>
    %11 = arith.truncf %10 : vector<16x384xf32> to vector<16x384xbf16>
    %c0_8 = arith.constant 0 : index
    %c0_9 = arith.constant 0 : index
    %12 = vector.load %arg15[%c0_8, %c0_9] : memref<16x384xbf16, #tpu.memory_space<vmem>>, vector<16x384xbf16>
    tpu.vector_store %arg15[%c0_8, %c0_9], %11 {strides = array<i32>} : memref<16x384xbf16, #tpu.memory_space<vmem>>, vector<16x384xbf16>,
    %cst_10 = arith.constant 0.000000e+00 : f32
    %13 = vector.broadcast %cst_10 : f32 to vector<16x256xf32>
    %c0_11 = arith.constant 0 : index
    %c0_12 = arith.constant 0 : index
    %14 = vector.load %arg15[%c0_11, %c0_12] : memref<16x384xbf16, #tpu.memory_space<vmem>>, vector<16x256xbf16>
    %15 = arith.extf %14 : vector<16x256xbf16> to vector<16x256xf32>
    %c0_13 = arith.constant 0 : index
    %c0_14 = arith.constant 0 : index
    %16 = vector.load %arg6[%c0_13, %c0_14] : memref<16x9xf32, #tpu.memory_space<vmem>>, vector<16x1xf32>
    %17 = vector.broadcast %16 : vector<16x1xf32> to vector<16x256xf32>
    %18 = arith.mulf %15, %17 : vector<16x256xf32>
    %19 = arith.addf %13, %18 : vector<16x256xf32>
    %c0_15 = arith.constant 0 : index
    %c1 = arith.constant 1 : index
    %20 = vector.load %arg15[%c0_15, %c1] : memref<16x384xbf16, #tpu.memory_space<vmem>>, vector<16x256xbf16>
    %21 = arith.extf %20 : vector<16x256xbf16> to vector<16x256xf32>
    %c0_16 = arith.constant 0 : index
    %c1_17 = arith.constant 1 : index
    %22 = vector.load %arg6[%c0_16, %c1_17] : memref<16x9xf32, #tpu.memory_space<vmem>>, vector<16x1xf32>
    %23 = vector.broadcast %22 : vector<16x1xf32> to vector<16x256xf32>
    %24 = arith.mulf %21, %23 : vector<16x256xf32>
    %25 = arith.addf %19, %24 : vector<16x256xf32>
    %c0_18 = arith.constant 0 : index
    %c2 = arith.constant 2 : index
    %26 = vector.load %arg15[%c0_18, %c2] : memref<16x384xbf16, #tpu.memory_space<vmem>>, vector<16x256xbf16>
    %27 = arith.extf %26 : vector<16x256xbf16> to vector<16x256xf32>
    %c0_19 = arith.constant 0 : index
    %c2_20 = arith.constant 2 : index
    %28 = vector.load %arg6[%c0_19, %c2_20] : memref<16x9xf32, #tpu.memory_space<vmem>>, vector<16x1xf32>
    %29 = vector.broadcast %28 : vector<16x1xf32> to vector<16x256xf32>
    %30 = arith.mulf %27, %29 : vector<16x256xf32>
    %31 = arith.addf %25, %30 : vector<16x256xf32>
    %c0_21 = arith.constant 0 : index
    %c16 = arith.constant 16 : index
    %32 = vector.load %arg15[%c0_21, %c16] : memref<16x384xbf16, #tpu.memory_space<vmem>>, vector<16x256xbf16>
    %33 = arith.extf %32 : vector<16x256xbf16> to vector<16x256xf32>
    %c0_22 = arith.constant 0 : index
    %c3 = arith.constant 3 : index
    %34 = vector.load %arg6[%c0_22, %c3] : memref<16x9xf32, #tpu.memory_space<vmem>>, vector<16x1xf32>
    %35 = vector.broadcast %34 : vector<16x1xf32> to vector<16x256xf32>
    %36 = arith.mulf %33, %35 : vector<16x256xf32>
    %37 = arith.addf %31, %36 : vector<16x256xf32>
    %c0_23 = arith.constant 0 : index
    %c17 = arith.constant 17 : index
    %38 = vector.load %arg15[%c0_23, %c17] : memref<16x384xbf16, #tpu.memory_space<vmem>>, vector<16x256xbf16>
    %39 = arith.extf %38 : vector<16x256xbf16> to vector<16x256xf32>
    %c0_24 = arith.constant 0 : index
    %c4 = arith.constant 4 : index
    %40 = vector.load %arg6[%c0_24, %c4] : memref<16x9xf32, #tpu.memory_space<vmem>>, vector<16x1xf32>
    %41 = vector.broadcast %40 : vector<16x1xf32> to vector<16x256xf32>
    %42 = arith.mulf %39, %41 : vector<16x256xf32>
    %43 = arith.addf %37, %42 : vector<16x256xf32>
    %c0_25 = arith.constant 0 : index
    %c18 = arith.constant 18 : index
    %44 = vector.load %arg15[%c0_25, %c18] : memref<16x384xbf16, #tpu.memory_space<vmem>>, vector<16x256xbf16>
    %45 = arith.extf %44 : vector<16x256xbf16> to vector<16x256xf32>
    %c0_26 = arith.constant 0 : index
    %c5 = arith.constant 5 : index
    %46 = vector.load %arg6[%c0_26, %c5] : memref<16x9xf32, #tpu.memory_space<vmem>>, vector<16x1xf32>
    %47 = vector.broadcast %46 : vector<16x1xf32> to vector<16x256xf32>
    %48 = arith.mulf %45, %47 : vector<16x256xf32>
    %49 = arith.addf %43, %48 : vector<16x256xf32>
    %c0_27 = arith.constant 0 : index
    %c32 = arith.constant 32 : index
    %50 = vector.load %arg15[%c0_27, %c32] : memref<16x384xbf16, #tpu.memory_space<vmem>>, vector<16x256xbf16>
    %51 = arith.extf %50 : vector<16x256xbf16> to vector<16x256xf32>
    %c0_28 = arith.constant 0 : index
    %c6 = arith.constant 6 : index
    %52 = vector.load %arg6[%c0_28, %c6] : memref<16x9xf32, #tpu.memory_space<vmem>>, vector<16x1xf32>
    %53 = vector.broadcast %52 : vector<16x1xf32> to vector<16x256xf32>
    %54 = arith.mulf %51, %53 : vector<16x256xf32>
    %55 = arith.addf %49, %54 : vector<16x256xf32>
    %c0_29 = arith.constant 0 : index
    %c33 = arith.constant 33 : index
    %56 = vector.load %arg15[%c0_29, %c33] : memref<16x384xbf16, #tpu.memory_space<vmem>>, vector<16x256xbf16>
    %57 = arith.extf %56 : vector<16x256xbf16> to vector<16x256xf32>
    %c0_30 = arith.constant 0 : index
    %c7 = arith.constant 7 : index
    %58 = vector.load %arg6[%c0_30, %c7] : memref<16x9xf32, #tpu.memory_space<vmem>>, vector<16x1xf32>
    %59 = vector.broadcast %58 : vector<16x1xf32> to vector<16x256xf32>
    %60 = arith.mulf %57, %59 : vector<16x256xf32>
    %61 = arith.addf %55, %60 : vector<16x256xf32>
    %c0_31 = arith.constant 0 : index
    %c34 = arith.constant 34 : index
    %62 = vector.load %arg15[%c0_31, %c34] : memref<16x384xbf16, #tpu.memory_space<vmem>>, vector<16x256xbf16>
    %63 = arith.extf %62 : vector<16x256xbf16> to vector<16x256xf32>
    %c0_32 = arith.constant 0 : index
    %c8 = arith.constant 8 : index
    %64 = vector.load %arg6[%c0_32, %c8] : memref<16x9xf32, #tpu.memory_space<vmem>>, vector<16x1xf32>
    %65 = vector.broadcast %64 : vector<16x1xf32> to vector<16x256xf32>
    %66 = arith.mulf %63, %65 : vector<16x256xf32>
    %67 = arith.addf %61, %66 : vector<16x256xf32>
    %c0_33 = arith.constant 0 : index
    %c0_34 = arith.constant 0 : index
    %68 = vector.load %arg7[%c0_33, %c0_34] : memref<16x1xf32, #tpu.memory_space<vmem>>, vector<16x1xf32>
    %69 = vector.broadcast %68 : vector<16x1xf32> to vector<16x256xf32>
    %70 = arith.addf %67, %69 : vector<16x256xf32>
    %cst_35 = arith.constant 0.000000e+00 : f32
    %cst_36 = arith.constant 6.000000e+00 : f32
    %71 = vector.broadcast %cst_35 : f32 to vector<16x256xf32>
    %72 = arith.maximumf %71, %70 : vector<16x256xf32>
    %73 = vector.broadcast %cst_36 : f32 to vector<16x256xf32>
    %74 = arith.minimumf %73, %72 : vector<16x256xf32>
    %75 = arith.truncf %74 : vector<16x256xf32> to vector<16x256xbf16>
    %c0_37 = arith.constant 0 : index
    %c0_38 = arith.constant 0 : index
    %c0_39 = arith.constant 0 : index
    %76 = vector.load %arg2[%c0_37, %c0_38, %c0_39] : memref<1x8x256xf32, #tpu.memory_space<vmem>>, vector<1x8x256xf32>
    %77 = vector.shape_cast %76 : vector<1x8x256xf32> to vector<8x256xf32>
    %c0_40 = arith.constant 0 : index
    %c0_41 = arith.constant 0 : index
    %c0_42 = arith.constant 0 : index
    %78 = vector.load %arg3[%c0_40, %c0_41, %c0_42] : memref<1x8x256xf32, #tpu.memory_space<vmem>>, vector<1x8x256xf32>
    %79 = vector.shape_cast %78 : vector<1x8x256xf32> to vector<8x256xf32>
    %c0_43 = arith.constant 0 : index
    %c0_44 = arith.constant 0 : index
    %80 = vector.load %arg8[%c0_43, %c0_44] : memref<8x16xbf16, #tpu.memory_space<vmem>>, vector<8x16xbf16>
    %cst_45 = arith.constant dense<0.000000e+00> : vector<8x256xf32>
    %81 = tpu.matmul %80, %75, %cst_45 {dimension_numbers = #tpu.dot_dimension_numbers<[1], [0], [0], [1], [0, 0, 1, 1], [], []>} : vector<8x16xbf16>, vector<16x256xbf16>, vector<8x256xf32> -> vector<8x256xf32>
    %c0_46 = arith.constant 0 : index
    %c0_47 = arith.constant 0 : index
    %82 = vector.load %arg9[%c0_46, %c0_47] : memref<8x8xbf16, #tpu.memory_space<vmem>>, vector<8x8xbf16>
    %83 = arith.truncf %77 : vector<8x256xf32> to vector<8x256xbf16>
    %cst_48 = arith.constant dense<0.000000e+00> : vector<8x256xf32>
    %84 = tpu.matmul %82, %83, %cst_48 {dimension_numbers = #tpu.dot_dimension_numbers<[1], [0], [0], [1], [0, 0, 1, 1], [], []>} : vector<8x8xbf16>, vector<8x256xbf16>, vector<8x256xf32> -> vector<8x256xf32>
    %85 = arith.addf %81, %84 : vector<8x256xf32>
    %c0_49 = arith.constant 0 : index
    %c0_50 = arith.constant 0 : index
    %86 = vector.load %arg10[%c0_49, %c0_50] : memref<8x1xf32, #tpu.memory_space<vmem>>, vector<8x1xf32>
    %87 = vector.broadcast %86 : vector<8x1xf32> to vector<8x256xf32>
    %88 = arith.addf %85, %87 : vector<8x256xf32>
    %89 = arith.truncf %88 : vector<8x256xf32> to vector<8x256xbf16>
    %c0_51 = arith.constant 0 : index
    %c0_52 = arith.constant 0 : index
    %90 = vector.load %arg11[%c0_51, %c0_52] : memref<32x8xbf16, #tpu.memory_space<vmem>>, vector<32x8xbf16>
    %cst_53 = arith.constant dense<0.000000e+00> : vector<32x256xf32>
    %91 = tpu.matmul %90, %89, %cst_53 {dimension_numbers = #tpu.dot_dimension_numbers<[1], [0], [0], [1], [0, 0, 1, 1], [], []>} : vector<32x8xbf16>, vector<8x256xbf16>, vector<32x256xf32> -> vector<32x256xf32>
    %c0_54 = arith.constant 0 : index
    %c0_55 = arith.constant 0 : index
    %92 = vector.load %arg12[%c0_54, %c0_55] : memref<32x1xf32, #tpu.memory_space<vmem>>, vector<32x1xf32>
    %93 = vector.broadcast %92 : vector<32x1xf32> to vector<32x256xf32>
    %94 = arith.addf %91, %93 : vector<32x256xf32>
    %95 = vector.extract_strided_slice %94 {offsets = [0, 0], sizes = [8, 256], strides = [1, 1]} : vector<32x256xf32> to vector<8x256xf32>
    %96 = vector.extract_strided_slice %94 {offsets = [8, 0], sizes = [8, 256], strides = [1, 1]} : vector<32x256xf32> to vector<8x256xf32>
    %97 = vector.extract_strided_slice %94 {offsets = [16, 0], sizes = [8, 256], strides = [1, 1]} : vector<32x256xf32> to vector<8x256xf32>
    %98 = vector.extract_strided_slice %94 {offsets = [24, 0], sizes = [8, 256], strides = [1, 1]} : vector<32x256xf32> to vector<8x256xf32>
    %99 = arith.negf %95 : vector<8x256xf32>
    %100 = math.exp %99 : vector<8x256xf32>
    %cst_56 = arith.constant 1.000000e+00 : f32
    %101 = vector.broadcast %cst_56 : f32 to vector<8x256xf32>
    %102 = arith.addf %101, %100 : vector<8x256xf32>
    %103 = arith.divf %101, %102 : vector<8x256xf32>
    %104 = arith.mulf %79, %103 : vector<8x256xf32>
    %105 = math.tanh %97 : vector<8x256xf32>
    %106 = arith.negf %96 : vector<8x256xf32>
    %107 = math.exp %106 : vector<8x256xf32>
    %cst_57 = arith.constant 1.000000e+00 : f32
    %108 = vector.broadcast %cst_57 : f32 to vector<8x256xf32>
    %109 = arith.addf %108, %107 : vector<8x256xf32>
    %110 = arith.divf %108, %109 : vector<8x256xf32>
    %111 = arith.mulf %105, %110 : vector<8x256xf32>
    %112 = arith.addf %104, %111 : vector<8x256xf32>
    %113 = math.tanh %112 : vector<8x256xf32>
    %114 = arith.negf %98 : vector<8x256xf32>
    %115 = math.exp %114 : vector<8x256xf32>
    %cst_58 = arith.constant 1.000000e+00 : f32
    %116 = vector.broadcast %cst_58 : f32 to vector<8x256xf32>
    %117 = arith.addf %116, %115 : vector<8x256xf32>
    %118 = arith.divf %116, %117 : vector<8x256xf32>
    %119 = arith.mulf %113, %118 : vector<8x256xf32>
    %c0_59 = arith.constant 0 : index
    %c0_60 = arith.constant 0 : index
    %c0_61 = arith.constant 0 : index
    %120 = vector.load %arg13[%c0_59, %c0_60, %c0_61] : memref<1x8x256xf32, #tpu.memory_space<vmem>>, vector<1x8x256xf32>
    %121 = vector.shape_cast %120 : vector<1x8x256xf32> to vector<8x256xf32>
    %122 = vector.shape_cast %119 : vector<8x256xf32> to vector<1x8x256xf32>
    tpu.vector_store %arg13[%c0_59, %c0_60, %c0_61], %122 {strides = array<i32>} : memref<1x8x256xf32, #tpu.memory_space<vmem>>, vector<1x8x256xf32>,
    %c0_62 = arith.constant 0 : index
    %c0_63 = arith.constant 0 : index
    %c0_64 = arith.constant 0 : index
    %123 = vector.load %arg14[%c0_62, %c0_63, %c0_64] : memref<1x8x256xf32, #tpu.memory_space<vmem>>, vector<1x8x256xf32>
    %124 = vector.shape_cast %123 : vector<1x8x256xf32> to vector<8x256xf32>
    %125 = vector.shape_cast %112 : vector<8x256xf32> to vector<1x8x256xf32>
    tpu.vector_store %arg14[%c0_62, %c0_63, %c0_64], %125 {strides = array<i32>} : memref<1x8x256xf32, #tpu.memory_space<vmem>>, vector<1x8x256xf32>,
    return
  }
  func.func @transform_0(%arg0: i32) -> (i32, i32, i32) {
    %c0_i32 = arith.constant 0 : i32
    %c0_i32_0 = arith.constant 0 : i32
    %c0_i32_1 = arith.constant 0 : i32
    return %arg0, %c0_i32, %c0_i32_0 : i32, i32, i32
  }
  func.func @transform_1(%arg0: i32) -> (i32, i32, i32) {
    %c0_i32 = arith.constant 0 : i32
    %c0_i32_0 = arith.constant 0 : i32
    %c0_i32_1 = arith.constant 0 : i32
    return %arg0, %c0_i32, %c0_i32_0 : i32, i32, i32
  }
  func.func @transform_2(%arg0: i32) -> (i32, i32, i32) {
    %c0_i32 = arith.constant 0 : i32
    %c0_i32_0 = arith.constant 0 : i32
    %c0_i32_1 = arith.constant 0 : i32
    return %arg0, %c0_i32, %c0_i32_0 : i32, i32, i32
  }
  func.func @transform_3(%arg0: i32) -> (i32, i32) {
    %c0_i32 = arith.constant 0 : i32
    %c0_i32_0 = arith.constant 0 : i32
    %c0_i32_1 = arith.constant 0 : i32
    return %c0_i32, %c0_i32_0 : i32, i32
  }
  func.func @transform_4(%arg0: i32) -> (i32, i32) {
    %c0_i32 = arith.constant 0 : i32
    %c0_i32_0 = arith.constant 0 : i32
    %c0_i32_1 = arith.constant 0 : i32
    return %c0_i32, %c0_i32_0 : i32, i32
  }
  func.func @transform_5(%arg0: i32) -> (i32, i32) {
    %c0_i32 = arith.constant 0 : i32
    %c0_i32_0 = arith.constant 0 : i32
    %c0_i32_1 = arith.constant 0 : i32
    return %c0_i32, %c0_i32_0 : i32, i32
  }
  func.func @transform_6(%arg0: i32) -> (i32, i32) {
    %c0_i32 = arith.constant 0 : i32
    %c0_i32_0 = arith.constant 0 : i32
    %c0_i32_1 = arith.constant 0 : i32
    return %c0_i32, %c0_i32_0 : i32, i32
  }
  func.func @transform_7(%arg0: i32) -> (i32, i32) {
    %c0_i32 = arith.constant 0 : i32
    %c0_i32_0 = arith.constant 0 : i32
    %c0_i32_1 = arith.constant 0 : i32
    return %c0_i32, %c0_i32_0 : i32, i32
  }
  func.func @transform_8(%arg0: i32) -> (i32, i32) {
    %c0_i32 = arith.constant 0 : i32
    %c0_i32_0 = arith.constant 0 : i32
    %c0_i32_1 = arith.constant 0 : i32
    return %c0_i32, %c0_i32_0 : i32, i32
  }
  func.func @transform_9(%arg0: i32) -> (i32, i32) {
    %c0_i32 = arith.constant 0 : i32
    %c0_i32_0 = arith.constant 0 : i32
    %c0_i32_1 = arith.constant 0 : i32
    return %c0_i32, %c0_i32_0 : i32, i32
  }
  func.func @transform_10(%arg0: i32) -> (i32, i32) {
    %c0_i32 = arith.constant 0 : i32
    %c0_i32_0 = arith.constant 0 : i32
    %c0_i32_1 = arith.constant 0 : i32
    return %c0_i32, %c0_i32_0 : i32, i32
  }
  func.func @transform_11(%arg0: i32) -> (i32, i32) {
    %c0_i32 = arith.constant 0 : i32
    %c0_i32_0 = arith.constant 0 : i32
    %c0_i32_1 = arith.constant 0 : i32
    return %c0_i32, %c0_i32_0 : i32, i32
  }
  func.func @transform_12(%arg0: i32) -> (i32, i32, i32) {
    %c0_i32 = arith.constant 0 : i32
    %c0_i32_0 = arith.constant 0 : i32
    %c0_i32_1 = arith.constant 0 : i32
    return %arg0, %c0_i32, %c0_i32_0 : i32, i32, i32
  }
  func.func @transform_13(%arg0: i32) -> (i32, i32, i32) {
    %c0_i32 = arith.constant 0 : i32
    %c0_i32_0 = arith.constant 0 : i32
    %c0_i32_1 = arith.constant 0 : i32
    return %arg0, %c0_i32, %c0_i32_0 : i32, i32, i32
  }
}

</mosaic_0001>

<bundles_post_ra>
// kernel: lstm_conv_dw_forward.1
= control target key start
LH: loop header
LB: loop body
LE: loop exit
PB: predicated region body
PF: predicated region fallthrough
CT: control target
= control target key end

     0   :  { %s1669_s25 = smov 0   ;;  %s2023_s0 = inlined_call_operand.vmem [shape: bf16[2,16,384], index: 0, kind: input, shape index: {}]   ;;  %s2024_s1 = inlined_call_operand.vmem [shape: f32[2,8,256], index: 1, kind: input, shape index: {}, may-alias: {1,12}]   ;;  %s2025_s2 = inlined_call_operand.vmem [shape: f32[2,8,256], index: 2, kind: input, shape index: {}, may-alias: {2,13}]   ;;  %s2026_s3 = inlined_call_operand.vmem [shape: bf16[16,16], index: 3, kind: input, shape index: {}]   ;;  %s2027_s4 = inlined_call_operand.vmem [shape: f32[16,1], index: 4, kind: input, shape index: {}]   ;;  %s2028_s5 = inlined_call_operand.vmem [shape: f32[16,9], index: 5, kind: input, shape index: {}]   ;;  %s2029_s6 = inlined_call_operand.vmem [shape: f32[16,1], index: 6, kind: input, shape index: {}]   ;;  %s2030_s7 = inlined_call_operand.vmem [shape: bf16[8,16], index: 7, kind: input, shape index: {}]   ;;  %s2031_s8 = inlined_call_operand.vmem [shape: bf16[8,8], index: 8, kind: input, shape index: {}]   ;;  %s2032_s9 = inlined_call_operand.vmem [shape: f32[8,1], index: 9, kind: input, shape index: {}]   ;;  %s2033_s10 = inlined_call_operand.vmem [shape: bf16[32,8], index: 10, kind: input, shape index: {}]   ;;  %s2034_s11 = inlined_call_operand.vmem [shape: f32[32,1], index: 11, kind: input, shape index: {}]   ;;  %s2035_s12 = inlined_call_operand.vmem [shape: f32[2,8,256], index: 12, kind: output, shape index: {0}, may-alias: {1,12}]   ;;  %s2036_s13 = inlined_call_operand.vmem [shape: f32[2,8,256], index: 13, kind: output, shape index: {1}, may-alias: {2,13}]  }
   0x1 LB: > { %s1442_s26 = sadd.s32 4294967295, %s1578_s25   ;;  %p1446_p0 = scmp.ge.s32.totalorder %s1578_s25, 1  ;;  %s1578_s25 = sphi %s1669_s25, %s24_s25  }
   0x2   : > { %p410_p1 = scmp.lt.s32.totalorder %s1578_s25, 3 }
   0x4   : > { %p411_p2 = pnand %p1446_p0, %p410_p1 }
   0x5   : > { %p469_p3 = scmp.lt.s32.totalorder (!%p411_p2), %s1442_s26, 1  ;;  %v1580_v0 = vmov (!%p411_p2), 0   ;;  %v1681_v1 = vld [vmem:[%s2028_s5] sm:$0xff] (!%p411_p2)  ;;  %v1581_v2 = vmov (!%p411_p2), 1   ;;  %v1582_v3 = vmov (!%p411_p2), 2   ;;  %v647_v4 = vld [vmem:[%s2028_s5 + $0x8] sm:$0xff] (!%p411_p2) }
   0x6   : > { %414 = sbr.rel (%p411_p2) target bundleno = 957 (0x3bd), region = 68  ;;  %570 = vmatprep.mubr.bf16.mxu1 (!%p411_p2), %v1580_v0  ;;  %1112 = vmatprep.mubr.bf16.mxu0 (!%p411_p2), %v1580_v0  ;;  %v1583_v7 = vmov (!%p411_p2), 3   ;;  %v1536_v8 = vld [vmem:[%s2026_s3] sm:$0xff] (!%p411_p2)   ;;  %vm534_vm0 = vcmask (!%p411_p2), 130048   ;;  %v1584_v10 = vmov (!%p411_p2), 0.0   ;;  %v1585_v11 = vmov (!%p411_p2), 5  }
   0x7   : > { %1518 = vset.pattern.permute.xlu1 (!%p411_p2), %v1581_v2  ;;  %1519 = vset.pattern.permute.xlu0 (!%p411_p2), %v1582_v3  ;;  %vm1586_vm1 = vmmov (!%p411_p2), 0   ;;  %v1587_v12 = vmov (!%p411_p2), 6   ;;  %v1588_v13 = vmov (!%p411_p2), 4   ;;  %v1589_v14 = vmov (!%p411_p2), 8   ;;  %v501_v15 = vld [vmem:[%s2027_s4] sm:$0xff] (!%p411_p2)  ;;  %v502_v16 = vld [vmem:[%s2027_s4 + $0x8] sm:$0xff] (!%p411_p2) }
   0x8   : > { %676 = vperm.xlu1 (!%p411_p2), %1518, %v1681_v1   ;;  %721 = vperm.xlu0 (!%p411_p2), %1519, %v1681_v1   ;;  %v1035_v17 = vld [vmem:[%s2029_s6] sm:$0xff] (!%p411_p2)  ;;  %v1590_v18 = vmov (!%p411_p2), 7   ;;  %v1036_v19 = vld [vmem:[%s2029_s6 + $0x8] sm:$0xff] (!%p411_p2)  ;;  %s1591_s30 = smov (!%p411_p2), 127   ;;  %s1592_s14 = smov (!%p411_p2), 126   ;;  %vm1073_vm2 = vcmask (!%p411_p2), 1043456  }
   0x9   : > { %s1593_s15 = smov (!%p411_p2), 112   ;;  %s1594_s16 = smov (!%p411_p2), 111   ;;  %vm1069_vm3 = vcmask (!%p411_p2), 64512   ;;  %vm707_vm4 = vcmask (!%p411_p2), 1039360   ;;  %vm752_vm5 = vcmask (!%p411_p2), 1031168   ;;  %vm797_vm6 = vcmask (!%p411_p2), 916480  }
   0xa   : > { %s1596_s18 = smov (!%p411_p2), 96   ;;  %s1597_s19 = smov (!%p411_p2), 95   ;;  %vm842_vm7 = vcmask (!%p411_p2), 908288   ;;  %vm887_vm8 = vcmask (!%p411_p2), 900096   ;;  %vm932_vm9 = vcmask (!%p411_p2), 785408   ;;  %vm977_vm10 = vcmask (!%p411_p2), 777216  }
   0xb   : > { %s1598_s20 = smov (!%p411_p2), 94   ;;  %vm1022_vm11 = vcmask (!%p411_p2), 769024  }
   0xc   : > { %680 = vperm.xlu1 (!%p411_p2), %1518, %v647_v4   ;;  %1522 = vset.pattern.permute.xlu0 (!%p411_p2), %v1583_v7 }
   0xd   : > { %s2038_s26 = smov (!%p469_p3, %s1442_s26), 1  ;;  %770 = vperm.xlu0 %1522, %v647_v4  }
   0xe   : > { %s1490_s29 = smul.u32 24, %s2038_s26  ;;  %s1912_s23 = sshll.u32 %s2038_s26, 4 }
   0xf   : > { %s478_s28 = scalar_lea.vmem %s2024_s1, %s1912_s23 }
  0x10   : > { %s473_s17 = scalar_lea.vmem %s2023_s0, %s1490_s29  ;;  %1520 = vset.pattern.permute.xlu1 %v1582_v3 }
  0x11   : > { %v1533_v5 = vld [vmem:[%s473_s17 + $0x4] ss:$12 sps:$4 sm:$0xff]   ;;  %v1535_v6 = vld [vmem:[%s473_s17] ss:$12 sps:$4 sm:$0xff]   ;;  %v1537_v9 = vld [vmem:[%s473_s17 + $0x8] ss:$12 sps:$4 sm:$0xff]   ;;  %725 = vperm.xlu1 %1520, %v647_v4   ;;  %1524 = vset.pattern.permute.xlu0 %v1585_v11 }
  0x12   : > { %538 = vmatprep.subr.bf16.mxu1 %v1533_v5  ;;  %856 = vperm.xlu0 %1524, %v1681_v1   ;;  %s1595_s17 = smov 110  }
  0x13   : > { %539 = vmatpush1.bf16.msra.mxu1 %v1535_v6 }
  0x14   : > { %1484 = vmatprep.subr.bf16.mxu1 %v1584_v10 }
  0x15   : > { %1521 = vset.pattern.permute.xlu1 %v1583_v7 }
  0x16   : > { %1460 = vmatmul.mubr.msk.bf16.vlgmr.msra.gmra.mrb[0].mxu1 %vm534_vm0, %v1536_v8  ;;  %766 = vperm.xlu1 %1521, %v1681_v1  }
  0x17   : > { %1485 = vmatpush3.bf16.msra.mxu1 %v1537_v9  ;;  %1486 = vmatprep.mubr.msk.bf16.mxu1 %vm1586_vm1, %v1584_v10 }
  0x18   : > { %1527 = vset.pattern.permute.xlu0 %v1587_v12 }
  0x19   : > { %905 = vperm.xlu0 %1527, %v647_v4  }
  0x1a   : > { %1523 = vset.pattern.permute.xlu1 %v1588_v13 }
  0x1b   : > { %811 = vperm.xlu1 %1523, %v1681_v1  }
  0x1d   : > { %1529 = vset.pattern.permute.xlu0 %v1589_v14 }
  0x1e   : > { %1487 = vmatmul.mubr.msk.bf16.vlgmr.msra.gmra.mrb[4].mxu1 %vm534_vm0, %v1536_v8  ;;  %991 = vperm.xlu0 %1529, %v1681_v1  }
  0x1f   : > { %1156 = vmatprep.mubr.bf16.mxu1 %v1580_v0  ;;  %815 = vperm.xlu1 %1523, %v647_v4  }
  0x22   : > { %1530 = vset.pattern.permute.xlu0 %v1580_v0 }
  0x23   : > { %505 = vperm.xlu0 %1530, %v501_v15   ;;  %1525 = vset.pattern.permute.xlu1 %v1585_v11 }
  0x24   : > { %860 = vperm.xlu1 %1525, %v647_v4  }
  0x27   : > { %510 = vperm.xlu0 %1530, %v502_v16  }
  0x28   : > { %1526 = vset.pattern.permute.xlu1 %v1587_v12 }
  0x29   : > { %901 = vperm.xlu1 %1526, %v1681_v1  }
  0x2b   : > { %655 = vperm.xlu0 %1530, %v647_v4  }
  0x2d   : > { %1528 = vset.pattern.permute.xlu1 %v1590_v18 }
  0x2e   : > { %946 = vperm.xlu1 %1528, %v1681_v1  }
  0x2f   : > { %1039 = vperm.xlu0 %1530, %v1035_v17  }
  0x32   : > { %950 = vperm.xlu1 %1528, %v647_v4  }
  0x36   : > { %1531 = vset.pattern.permute.xlu1 %v1589_v14 }
  0x37   : > { %995 = vperm.xlu1 %1531, %v647_v4  }
  0x3b   : > { %1532 = vset.pattern.permute.xlu1 %v1580_v0 }
  0x3c   : > { %650 = vperm.xlu1 %1532, %v1681_v1  }
  0x40   : > { %1044 = vperm.xlu1 %1532, %v1036_v19  }
  0x87   : > { %v1722_v20 = vpop.permute.xlu1 %676  ;;  %v1730_v24 = vpop.permute.xlu0 %721 }
  0x8b   : > { %v1724_v21 = vpop.permute.xlu1 %680 }
  0x8c   : > { %v1734_v26 = vpop.permute.xlu0 %770 }
  0x90   : > { %v1726_v22 = vpop.permute.xlu1 %725 }
  0x91   : > { %v1738_v28 = vpop.permute.xlu0 %856 }
  0x95   : > { %v1728_v23 = vpop.permute.xlu1 %766 }
  0x98   : > { %v1742_v30 = vpop.permute.xlu0 %905 }
  0x9a   : > { %v1732_v25 = vpop.permute.xlu1 %811 }
  0x9d   : > { %v1746_v32 = vpop.permute.xlu0 %991 }
  0x9e   : > { %v1736_v27 = vpop.permute.xlu1 %815 }
  0xa2   : > { %v506_v34 = vpop.permute.xlu0 %505 }
  0xa3   : > { %v1740_v29 = vpop.permute.xlu1 %860 }
  0xa6   : > { %v511_v39 = vpop.permute.xlu0 %510 }
  0xa8   : > { %v1744_v31 = vpop.permute.xlu1 %901 }
  0xad   : > { %v1748_v33 = vpop.permute.xlu1 %946 }
  0xb1   : > { %v1750_v35 = vpop.permute.xlu1 %950 }
  0xb6   : > { %v1752_v48 = vpop.permute.xlu1 %995 }
  0xbb   : > { %v651_v1 = vpop.permute.xlu1 %650 }
  0xe9   : > { %v572_v36 = vpop.f32.mrb[0].mxu1 }
  0xea   : > { %v573_v37 = vadd.f32 %v572_v36, %v506_v34  ;;  %v574_v38 = vpop.f32.mrb[1].mxu1 }
  0xeb   : > { %v575_v40 = vadd.f32 %v574_v38, %v506_v34  ;;  %v576_v41 = vpop.f32.mrb[2].mxu1 }
  0xec   : > { %v622_v42 = vmax.f32 %v573_v37, 0.0  ;;  %v577_v43 = vadd.f32 %v576_v41, %v511_v39  ;;  %v578_v44 = vpop.f32.mrb[3].mxu1 }
  0xed   : > { %v623_v45 = vmax.f32 %v575_v40, 0.0  ;;  %v579_v46 = vadd.f32 %v578_v44, %v511_v39 }
  0xee   : > { %v625_v47 = vmax.f32 %v577_v43, 0.0  ;;  %v628_v50 = vmin.f32 %v622_v42, 6.0 }
  0xef   : > { %v626_v49 = vmax.f32 %v579_v46, 0.0  ;;  %v629_v52 = vmin.f32 %v623_v45, 6.0 }
  0xf0   : > { %v631_v51 = vmin.f32 %v625_v47, 6.0 }
  0xf1   : > { %v632_v53 = vmin.f32 %v626_v49, 6.0  ;;  %v615_v54 = vpop.f32.mrb[4].mxu1 }
  0xf2   : > { %v634_v55 = vpack.c.bf16 %v631_v51, %v628_v50  ;;  %v616_v56 = vadd.f32 %v615_v54, %v506_v34  ;;  %v1488_v57 = vpop.f32.mrb[5].mxu1 }
  0xf3   : > { %v635_v58 = vpack.c.bf16 %v632_v53, %v629_v52  ;;  %v618_v59 = vpop.f32.mrb[6].mxu1 }
  0xf4   : > { %v1754_v60 = vunpack.c.l.bf16 %v634_v55  ;;  %v1756_v61 = vunpack.c.h.bf16 %v634_v55  ;;  %v624_v62 = vmax.f32 %v616_v56, 0.0  ;;  %v619_v63 = vadd.f32 %v618_v59, %v511_v39  ;;  %v1489_v2 = vpop.f32.mrb[7].mxu1 }
  0xf5   : > { %v1758_v3 = vunpack.c.l.bf16 %v635_v58  ;;  %v1802_v37 = vunpack.c.h.bf16 %v635_v58 }
  0xf6   : > { %v627_v4 = vmax.f32 %v619_v63, 0.0  ;;  %v1761_v5 = vmul.f32 %v651_v1, %v1754_v60  ;;  %v630_v7 = vmin.f32 %v624_v62, 6.0  ;;  %v686_v9 = vmul.f32 %v1724_v21, %v1756_v61 }
  0xf7   : > { %v1764_v6 = vmul.f32 %v651_v1, %v1758_v3  ;;  %v683_v10 = vmul.f32 %v1722_v20, %v1754_v60  ;;  %v731_v12 = vmul.f32 %v1726_v22, %v1756_v61  ;;  %v728_v13 = vmul.f32 %v1730_v24, %v1754_v60  ;;  %v1165_v1 = vld [vmem:[%s2032_s9] sm:$0xff] }
  0xf8   : > { %v633_v8 = vmin.f32 %v627_v4, 6.0  ;;  %701 = vrot.lane.b32.xlu1 %v686_v9, %s1591_s30  ;;  %v776_v14 = vmul.f32 %v1734_v26, %v1756_v61  ;;  %v773_v15 = vmul.f32 %v1728_v23, %v1754_v60  ;;  %v821_v16 = vmul.f32 %v1736_v27, %v1756_v61  ;;  %v1179_v9 = vld [vmem:[%s2034_s11] sm:$0xff] }
  0xf9   : > { %695 = vrot.lane.b32.xlu0 %v683_v10, %s1591_s30  ;;  %v818_v17 = vmul.f32 %v1732_v25, %v1754_v60  ;;  %v866_v18 = vmul.f32 %v1740_v29, %v1756_v61  ;;  %v863_v19 = vmul.f32 %v1738_v28, %v1754_v60  ;;  %v911_v34 = vmul.f32 %v1742_v30, %v1756_v61  ;;  %v1182_v10 = vld [vmem:[%s2034_s11 + $0x18] sm:$0xff] }
  0xfa   : > { %v636_v11 = vpack.c.bf16 %v633_v8, %v630_v7  ;;  %v908_v36 = vmul.f32 %v1744_v31, %v1754_v60  ;;  %v956_v38 = vmul.f32 %v1750_v35, %v1756_v61  ;;  %v953_v39 = vmul.f32 %v1748_v33, %v1754_v60 }
  0xfb   : > { %v684_v41 = vmul.f32 %v1722_v20, %v1758_v3  ;;  %v687_v42 = vmul.f32 %v1724_v21, %v1802_v37  ;;  %v729_v45 = vmul.f32 %v1730_v24, %v1758_v3  ;;  %v732_v47 = vmul.f32 %v1726_v22, %v1802_v37 }
  0xfc   : > { %746 = vrot.lane.b32.xlu1 %v731_v12, %s1592_s14  ;;  %v1810_v40 = vunpack.c.l.bf16 %v636_v11  ;;  %v1818_v43 = vunpack.c.h.bf16 %v636_v11  ;;  %v774_v49 = vmul.f32 %v1728_v23, %v1758_v3  ;;  %v777_v50 = vmul.f32 %v1734_v26, %v1802_v37  ;;  %v1181_v11 = vld [vmem:[%s2034_s11 + $0x10] sm:$0xff]  ;;  %v1939_v12 = vpop.permute.xlu0 %655 }
  0xfd   : > { %740 = vrot.lane.b32.xlu0 %v728_v13, %s1592_s14  ;;  %v819_v51 = vmul.f32 %v1732_v25, %v1758_v3  ;;  %v822_v52 = vmul.f32 %v1736_v27, %v1802_v37  ;;  %v864_v53 = vmul.f32 %v1738_v28, %v1758_v3  ;;  %v867_v54 = vmul.f32 %v1740_v29, %v1802_v37 }
  0xfe   : > { %v685_v44 = vmul.f32 %v1722_v20, %v1810_v40  ;;  %v688_v46 = vmul.f32 %v1724_v21, %v1818_v43  ;;  %v730_v20 = vmul.f32 %v1730_v24, %v1810_v40  ;;  %v733_v21 = vmul.f32 %v1726_v22, %v1818_v43 }
  0xff   : > { %v775_v24 = vmul.f32 %v1728_v23, %v1810_v40  ;;  %v778_v22 = vmul.f32 %v1734_v26, %v1818_v43  ;;  %v820_v23 = vmul.f32 %v1732_v25, %v1810_v40  ;;  %v823_v26 = vmul.f32 %v1736_v27, %v1818_v43 }
 0x100   : > { %791 = vrot.lane.b32.xlu1 %v776_v14, %s1593_s15  ;;  %v865_v25 = vmul.f32 %v1738_v28, %v1810_v40  ;;  %v909_v55 = vmul.f32 %v1744_v31, %v1758_v3  ;;  %v868_v27 = vmul.f32 %v1740_v29, %v1818_v43  ;;  %v912_v56 = vmul.f32 %v1742_v30, %v1802_v37  ;;  %v1941_v13 = vpop.permute.xlu0 %1039  ;;  %v1943_v14 = vpop.permute.xlu1 %1044 }
 0x101   : > { %785 = vrot.lane.b32.xlu0 %v773_v15, %s1593_s15  ;;  %v910_v28 = vmul.f32 %v1744_v31, %v1810_v40  ;;  %v954_v57 = vmul.f32 %v1748_v33, %v1758_v3  ;;  %v957_v29 = vmul.f32 %v1750_v35, %v1802_v37  ;;  %v913_v58 = vmul.f32 %v1742_v30, %v1818_v43 }
 0x102   : > { %v955_v31 = vmul.f32 %v1748_v33, %v1810_v40  ;;  %v999_v59 = vmul.f32 %v1746_v32, %v1758_v3  ;;  %v1002_v62 = vmul.f32 %v1752_v48, %v1802_v37  ;;  %v958_v30 = vmul.f32 %v1750_v35, %v1818_v43  ;;  %v1062_v35 = vld [vmem:[%s478_s28 + $0x8] sm:$0xff]  ;;  %v1061_v3 = vld [vmem:[%s478_s28] sm:$0xff] }
 0x103   : > { %v1000_v63 = vmul.f32 %v1746_v32, %v1810_v40  ;;  %v998_v33 = vmul.f32 %v1746_v32, %v1754_v60  ;;  %v1003_v2 = vmul.f32 %v1752_v48, %v1818_v43  ;;  %v1180_v32 = vld [vmem:[%s2034_s11 + $0x8] sm:$0xff]  ;;  %v1068_v60 = vpack.c.bf16 %v1062_v35, %v1062_v35 }
 0x104   : > { %836 = vrot.lane.b32.xlu1 %v821_v16, %s1594_s16  ;;  %v1001_v4 = vmul.f32 %v1752_v48, %v1756_v61  ;;  %v1067_v7 = vpack.c.bf16 %v1061_v3, %v1061_v3  ;;  %v1066_v48 = vld [vmem:[%s2031_s8] sm:$0xf] }
 0x105   : > { %830 = vrot.lane.b32.xlu0 %v818_v17, %s1594_s16  ;;  %1462 = vmatprep.subr.msk.bf16.mxu0 %vm1073_vm2, %v1068_v60 }
 0x106   : > { %v1075_v8 = vsel %vm1073_vm2, %v1067_v7, 0 }
 0x107   : > { %1081 = vmatpush1.bf16.msra.mxu0 %v1075_v8 }
 0x108   : > { %881 = vrot.lane.b32.xlu1 %v866_v18, %s1595_s17 }
 0x109   : > { %875 = vrot.lane.b32.xlu0 %v863_v19, %s1595_s17 }
 0x10a   : > { %1463 = vmatmul.mubr.msk.bf16.vlgmr.msra.gmra.mrb[0].mxu0 %vm1069_vm3, %v1066_v48 }
 0x10b   : > { %1257 = vmatprep.mubr.bf16.mxu0 %v1580_v0 }
 0x10c   : > { %926 = vrot.lane.b32.xlu1 %v911_v34, %s1596_s18 }
 0x10d   : > { %920 = vrot.lane.b32.xlu0 %v908_v36, %s1596_s18 }
 0x110   : > { %971 = vrot.lane.b32.xlu1 %v956_v38, %s1597_s19 }
 0x111   : > { %965 = vrot.lane.b32.xlu0 %v953_v39, %s1597_s19 }
 0x114   : > { %697 = vrot.lane.b32.xlu1 %v684_v41, %s1591_s30 }
 0x115   : > { %703 = vrot.lane.b32.xlu0 %v687_v42, %s1591_s30 }
 0x118   : > { %699 = vrot.lane.b32.xlu1 %v685_v44, %s1591_s30 }
 0x119   : > { %742 = vrot.lane.b32.xlu0 %v729_v45, %s1592_s14 }
 0x11c   : > { %705 = vrot.lane.b32.xlu1 %v688_v46, %s1591_s30  ;;  %v660_v46 = vmul.f32 %v1939_v12, %v1756_v61 }
 0x11d   : > { %748 = vrot.lane.b32.xlu0 %v732_v47, %s1592_s14 }
 0x120   : > { %744 = vrot.lane.b32.xlu1 %v730_v20, %s1592_s14 }
 0x121   : > { %787 = vrot.lane.b32.xlu0 %v774_v49, %s1593_s15 }
 0x124   : > { %750 = vrot.lane.b32.xlu1 %v733_v21, %s1592_s14  ;;  %s483_s14 = scalar_lea.vmem %s2025_s2, %s1912_s23 }
 0x125   : > { %793 = vrot.lane.b32.xlu0 %v777_v50, %s1593_s15 }
 0x128   : > { %789 = vrot.lane.b32.xlu1 %v775_v24, %s1593_s15 }
 0x129   : > { %832 = vrot.lane.b32.xlu0 %v819_v51, %s1594_s16 }
 0x12c   : > { %795 = vrot.lane.b32.xlu1 %v778_v22, %s1593_s15 }
 0x12d   : > { %838 = vrot.lane.b32.xlu0 %v822_v52, %s1594_s16 }
 0x130   : > { %834 = vrot.lane.b32.xlu1 %v820_v23, %s1594_s16 }
 0x131   : > { %877 = vrot.lane.b32.xlu0 %v864_v53, %s1595_s17 }
 0x134   : > { %840 = vrot.lane.b32.xlu1 %v823_v26, %s1594_s16 }
 0x135   : > { %883 = vrot.lane.b32.xlu0 %v867_v54, %s1595_s17 }
 0x138   : > { %879 = vrot.lane.b32.xlu1 %v865_v25, %s1595_s17 }
 0x139   : > { %922 = vrot.lane.b32.xlu0 %v909_v55, %s1596_s18 }
 0x13c   : > { %885 = vrot.lane.b32.xlu1 %v868_v27, %s1595_s17  ;;  %s493_s17 = scalar_lea.vmem %s2036_s13, %s1912_s23 }
 0x13d   : > { %928 = vrot.lane.b32.xlu0 %v912_v56, %s1596_s18 }
 0x140   : > { %924 = vrot.lane.b32.xlu1 %v910_v28, %s1596_s18 }
 0x141   : > { %967 = vrot.lane.b32.xlu0 %v954_v57, %s1597_s19 }
 0x144   : > { %930 = vrot.lane.b32.xlu1 %v913_v58, %s1596_s18 }
 0x145   : > { %973 = vrot.lane.b32.xlu0 %v957_v29, %s1597_s19 }
 0x148   : > { %969 = vrot.lane.b32.xlu1 %v955_v31, %s1597_s19 }
 0x149   : > { %1012 = vrot.lane.b32.xlu0 %v999_v59, %s1598_s20 }
 0x14c   : > { %975 = vrot.lane.b32.xlu1 %v958_v30, %s1597_s19 }
 0x14d   : > { %1018 = vrot.lane.b32.xlu0 %v1002_v62, %s1598_s20 }
 0x150   : > { %1014 = vrot.lane.b32.xlu1 %v1000_v63, %s1598_s20 }
 0x151   : > { %1010 = vrot.lane.b32.xlu0 %v998_v33, %s1598_s20 }
 0x154   : > { %1020 = vrot.lane.b32.xlu1 %v1003_v2, %s1598_s20 }
 0x155   : > { %1168 = vperm.xlu0 %1530, %v1165_v1  }
 0x158   : > { %1016 = vrot.lane.b32.xlu1 %v1001_v4, %s1598_s20  ;;  %s488_s20 = scalar_lea.vmem %s2035_s12, %s1912_s23 }
 0x159   : > { %1190 = vperm.xlu0 %1530, %v1180_v32  }
 0x15c   : > { %1185 = vperm.xlu1 %1532, %v1179_v9  }
 0x15d   : > { %1200 = vperm.xlu0 %1530, %v1182_v10  }
 0x160   : > { %1195 = vperm.xlu1 %1532, %v1181_v11  }
 0x16a   : > { %v702_v15 = vpop.permute.xlu1 %701 }
 0x16b   : > { %v696_v16 = vpop.permute.xlu0 %695 }
 0x16e   : > { %v747_v17 = vpop.permute.xlu1 %746 }
 0x16f   : > { %v741_v18 = vpop.permute.xlu0 %740 }
 0x172   : > { %v792_v19 = vpop.permute.xlu1 %791 }
 0x173   : > { %v786_v34 = vpop.permute.xlu0 %785 }
 0x176   : > { %v837_v36 = vpop.permute.xlu1 %836 }
 0x177   : > { %v831_v38 = vpop.permute.xlu0 %830 }
 0x17a   : > { %v882_v39 = vpop.permute.xlu1 %881 }
 0x17b   : > { %v876_v40 = vpop.permute.xlu0 %875 }
 0x17e   : > { %v927_v41 = vpop.permute.xlu1 %926 }
 0x17f   : > { %v921_v42 = vpop.permute.xlu0 %920 }
 0x182   : > { %v1945_v43 = vpop.permute.xlu1 %971 }
 0x183   : > { %v1947_v44 = vpop.permute.xlu0 %965 }
 0x186   : > { %v698_v45 = vpop.permute.xlu1 %697 }
 0x187   : > { %v704_v47 = vpop.permute.xlu0 %703  ;;  %v708_v20 = vsel %vm707_vm4, %v696_v16, %v698_v45 }
 0x188   : > { %v710_v49 = vsel %vm707_vm4, %v702_v15, %v704_v47  ;;  %v716_v21 = vadd.f32 %v708_v20, %v1761_v5 }
 0x189   : > { %v718_v50 = vadd.f32 %v710_v49, %v660_v46 }
 0x18a   : > { %v700_v24 = vpop.permute.xlu1 %699 }
 0x18b   : > { %v743_v51 = vpop.permute.xlu0 %742 }
 0x18c   : > { %v753_v22 = vsel %vm752_vm5, %v741_v18, %v743_v51 }
 0x18d   : > { %v761_v52 = vadd.f32 %v753_v22, %v716_v21 }
 0x18e   : > { %v706_v23 = vpop.permute.xlu1 %705 }
 0x18f   : > { %v749_v53 = vpop.permute.xlu0 %748  ;;  %v711_v46 = vsel %vm707_vm4, %v704_v47, %v706_v23 }
 0x190   : > { %v755_v26 = vsel %vm752_vm5, %v747_v17, %v749_v53 }
 0x191   : > { %v763_v54 = vadd.f32 %v755_v26, %v718_v50 }
 0x192   : > { %v745_v61 = vpop.permute.xlu1 %744 }
 0x193   : > { %v788_v25 = vpop.permute.xlu0 %787 }
 0x194   : > { %v798_v55 = vsel %vm797_vm6, %v786_v34, %v788_v25  ;;  %v709_v34 = vsel %vm707_vm4, %v698_v45, %v700_v24 }
 0x195   : > { %v806_v27 = vadd.f32 %v798_v55, %v761_v52 }
 0x196   : > { %v751_v56 = vpop.permute.xlu1 %750 }
 0x197   : > { %v794_v5 = vpop.permute.xlu0 %793  ;;  %v756_v45 = vsel %vm752_vm5, %v749_v53, %v751_v56 }
 0x198   : > { %v800_v28 = vsel %vm797_vm6, %v792_v19, %v794_v5 }
 0x199   : > { %v808_v57 = vadd.f32 %v800_v28, %v763_v54 }
 0x19a   : > { %v790_v29 = vpop.permute.xlu1 %789 }
 0x19b   : > { %v833_v58 = vpop.permute.xlu0 %832 }
 0x19c   : > { %v843_v31 = vsel %vm842_vm7, %v831_v38, %v833_v58  ;;  %v717_v38 = vadd.f32 %v709_v34, %v1764_v6 }
 0x19d   : > { %v851_v59 = vadd.f32 %v843_v31, %v806_v27 }
 0x19e   : > { %v796_v62 = vpop.permute.xlu1 %795 }
 0x19f   : > { %v839_v30 = vpop.permute.xlu0 %838  ;;  %v801_v47 = vsel %vm797_vm6, %v794_v5, %v796_v62 }
 0x1a0   : > { %v845_v63 = vsel %vm842_vm7, %v837_v36, %v839_v30  ;;  %v754_v36 = vsel %vm752_vm5, %v743_v51, %v745_v61 }
 0x1a1   : > { %v853_v33 = vadd.f32 %v845_v63, %v808_v57  ;;  %v762_v49 = vadd.f32 %v754_v36, %v717_v38 }
 0x1a2   : > { %v835_v1 = vpop.permute.xlu1 %834 }
 0x1a3   : > { %v878_v2 = vpop.permute.xlu0 %877  ;;  %v844_v50 = vsel %vm842_vm7, %v833_v58, %v835_v1 }
 0x1a4   : > { %v888_v35 = vsel %vm887_vm8, %v876_v40, %v878_v2 }
 0x1a5   : > { %v896_v32 = vadd.f32 %v888_v35, %v851_v59 }
 0x1a6   : > { %v841_v60 = vpop.permute.xlu1 %840 }
 0x1a7   : > { %v884_v3 = vpop.permute.xlu0 %883 }
 0x1a8   : > { %v890_v4 = vsel %vm887_vm8, %v882_v39, %v884_v3 }
 0x1a9   : > { %v898_v7 = vadd.f32 %v890_v4, %v853_v33 }
 0x1aa   : > { %v880_v8 = vpop.permute.xlu1 %879 }
 0x1ab   : > { %v923_v9 = vpop.permute.xlu0 %922  ;;  %v889_v52 = vsel %vm887_vm8, %v878_v2, %v880_v8 }
 0x1ac   : > { %v933_v10 = vsel %vm932_vm9, %v921_v42, %v923_v9  ;;  %v799_v42 = vsel %vm797_vm6, %v788_v25, %v790_v29 }
 0x1ad   : > { %v941_v48 = vadd.f32 %v933_v10, %v896_v32  ;;  %v807_v24 = vadd.f32 %v799_v42, %v762_v49 }
 0x1ae   : > { %v886_v11 = vpop.permute.xlu1 %885 }
 0x1af   : > { %v929_v15 = vpop.permute.xlu0 %928  ;;  %v852_v26 = vadd.f32 %v844_v50, %v807_v24  ;;  %v891_v25 = vsel %vm887_vm8, %v884_v3, %v886_v11 }
 0x1b0   : > { %v935_v16 = vsel %vm932_vm9, %v927_v41, %v929_v15  ;;  %v661_v41 = vmul.f32 %v1939_v12, %v1802_v37 }
 0x1b1   : > { %v943_v17 = vadd.f32 %v935_v16, %v898_v7  ;;  %v897_v54 = vadd.f32 %v889_v52, %v852_v26  ;;  %v1539_v26 = vld [vmem:[%s2033_s10 + $0x8] sm:$0xff]  }
 0x1b2   : > { %v925_v18 = vpop.permute.xlu1 %924  ;;  %v719_v6 = vadd.f32 %v711_v46, %v661_v41 }
 0x1b3   : > { %v968_v19 = vpop.permute.xlu0 %967  ;;  %v934_v37 = vsel %vm932_vm9, %v923_v9, %v925_v18 }
 0x1b4   : > { %v764_v23 = vadd.f32 %v756_v45, %v719_v6  ;;  %v942_v56 = vadd.f32 %v934_v37, %v897_v54  ;;  %v978_v5 = vsel %vm977_vm10, %v1947_v44, %v968_v19 }
 0x1b5   : > { %v986_v63 = vadd.f32 %v978_v5, %v941_v48 }
 0x1b6   : > { %v931_v39 = vpop.permute.xlu1 %930  ;;  %v809_v12 = vadd.f32 %v801_v47, %v764_v23  ;;  %v1538_v23 = vld [vmem:[%s2033_s10] sm:$0xff]  }
 0x1b7   : > { %v974_v40 = vpop.permute.xlu0 %973  ;;  %v936_v28 = vsel %vm932_vm9, %v929_v15, %v931_v39 }
 0x1b8   : > { %v980_v20 = vsel %vm977_vm10, %v1945_v43, %v974_v40  ;;  %v846_v43 = vsel %vm842_vm7, %v839_v30, %v841_v60 }
 0x1b9   : > { %v988_v21 = vadd.f32 %v980_v20, %v943_v17  ;;  %v854_v27 = vadd.f32 %v846_v43, %v809_v12 }
 0x1ba   : > { %v970_v51 = vpop.permute.xlu1 %969 }
 0x1bb   : > { %v1013_v22 = vpop.permute.xlu0 %1012  ;;  %v979_v55 = vsel %vm977_vm10, %v968_v19, %v970_v51  ;;  %v899_v57 = vadd.f32 %v891_v25, %v854_v27 }
 0x1bc   : > { %v987_v29 = vadd.f32 %v979_v55, %v942_v56 }
 0x1bd   : > { %v944_v33 = vadd.f32 %v936_v28, %v899_v57 }
 0x1be   : > { %v976_v61 = vpop.permute.xlu1 %975 }
 0x1bf   : > { %v1019_v53 = vpop.permute.xlu0 %1018  ;;  %v981_v59 = vsel %vm977_vm10, %v974_v40, %v976_v61 }
 0x1c0   : > { %v989_v2 = vadd.f32 %v981_v59, %v944_v33 }
 0x1c2   : > { %v1015_v58 = vpop.permute.xlu1 %1014 }
 0x1c3   : > { %v1011_v31 = vpop.permute.xlu0 %1010  ;;  %v1024_v62 = vsel %vm1022_vm11, %v1013_v22, %v1015_v58 }
 0x1c4   : > { %v1023_v30 = vsel %vm1022_vm11, %v1011_v31, %v1013_v22  ;;  %v1032_v1 = vadd.f32 %v1024_v62, %v987_v29 }
 0x1c5   : > { %v1031_v32 = vadd.f32 %v1023_v30, %v986_v63 }
 0x1c6   : > { %v1048_v35 = vadd.f32 %v1941_v13, %v1032_v1  ;;  %v1021_v44 = vpop.permute.xlu1 %1020 }
 0x1c7   : > { %v1026_v60 = vsel %vm1022_vm11, %v1019_v53, %v1021_v44  ;;  %v1047_v7 = vadd.f32 %v1941_v13, %v1031_v32  ;;  %v1065_v13 = vld [vmem:[%s2030_s7] sm:$0xf] }
 0x1c8   : > { %v1034_v3 = vadd.f32 %v1026_v60, %v989_v2  ;;  %v1052_v4 = vmax.f32 %v1048_v35, 0.0 }
 0x1c9   : > { %v1051_v16 = vmax.f32 %v1047_v7, 0.0 }
 0x1ca   : > { %v1050_v8 = vadd.f32 %v1943_v14, %v1034_v3  ;;  %v1017_v9 = vpop.permute.xlu1 %1016  ;;  %v1056_v15 = vmin.f32 %v1052_v4, 6.0 }
 0x1cb   : > { %v1025_v10 = vsel %vm1022_vm11, %v1017_v9, %v1019_v53  ;;  %v1055_v36 = vmin.f32 %v1051_v16, 6.0  ;;  %v1063_v16 = vld [vmem:[%s483_s14] sm:$0xff] }
 0x1cc   : > { %v1054_v11 = vmax.f32 %v1050_v8, 0.0  ;;  %v1033_v48 = vadd.f32 %v1025_v10, %v988_v21 }
 0x1ce   : > { %v1058_v17 = vmin.f32 %v1054_v11, 6.0  ;;  %v1049_v18 = vadd.f32 %v1943_v14, %v1033_v48 }
 0x1d0   : > { %v1053_v19 = vmax.f32 %v1049_v18, 0.0  ;;  %v1060_v34 = vpack.c.bf16 %v1058_v17, %v1056_v15  ;;  %v1064_v18 = vld [vmem:[%s483_s14 + $0x8] sm:$0xff] }
 0x1d2   : > { %v1057_v38 = vmin.f32 %v1053_v19, 6.0  ;;  %1124 = vmatprep.subr.bf16.mxu1 %v1060_v34 }
 0x1d4   : > { %v1059_v39 = vpack.c.bf16 %v1057_v38, %v1055_v36  ;;  %v1169_v21 = vpop.permute.xlu0 %1168 }
 0x1d6   : > { %1125 = vmatpush1.bf16.msra.mxu1 %v1059_v39 }
 0x1d8   : > { %v1191_v61 = vpop.permute.xlu0 %1190 }
 0x1d9   : > { %1464 = vmatmul.mubr.msk.bf16.vlgmr.msra.gmra.mrb[8].mxu1 %vm534_vm0, %v1065_v13 }
 0x1db   : > { %v1186_v43 = vpop.permute.xlu1 %1185 }
 0x1dc   : > { %v1201_v59 = vpop.permute.xlu0 %1200 }
 0x1dd   : > { %v1114_v40 = vpop.f32.mrb[0].mxu0 }
 0x1de   : > { %v1116_v46 = vpop.f32.mrb[1].mxu0 }
 0x1df   : > { %v1118_v42 = vpop.f32.mrb[2].mxu0  ;;  %v1196_v58 = vpop.permute.xlu1 %1195 }
 0x1e0   : > { %v1119_v20 = vpop.f32.mrb[3].mxu0 }
 0x2ac   : > { %v1158_v41 = vpop.f32.mrb[8].mxu1 }
 0x2ad   : > { %v1159_v49 = vadd.f32 %v1158_v41, %v1114_v40  ;;  %v1160_v14 = vpop.f32.mrb[9].mxu1 }
 0x2ae   : > { %v1161_v45 = vadd.f32 %v1160_v14, %v1116_v46  ;;  %v1162_v50 = vpop.f32.mrb[10].mxu1 }
 0x2af   : > { %v1171_v6 = vadd.f32 %v1169_v21, %v1159_v49  ;;  %v1163_v24 = vpop.f32.mrb[11].mxu1 }
 0x2b0   : > { %v1172_v51 = vadd.f32 %v1169_v21, %v1161_v45 }
 0x2b1   : > { %v1173_v22 = vpack.c.bf16 %v1171_v6, %v1171_v6 }
 0x2b2   : > { %v1174_v47 = vpack.c.bf16 %v1172_v51, %v1172_v51 }
 0x2b3   : > { %v1220_v52 = vsel %vm1073_vm2, %v1173_v22, 0 }
 0x2b4   : > { %1467 = vmatprep.subr.msk.bf16.mxu0 %vm1073_vm2, %v1174_v47 }
 0x2b5   : > { %1226 = vmatpush1.bf16.msra.mxu0 %v1220_v52 }
 0x2b8   : > { %1468 = vmatmul.mubr.msk.bf16.vlgmr.msra.gmra.mrb[4].mxu0 %vm1069_vm3, %v1538_v23 }
 0x2b9   : > { %1267 = vmatprep.mubr.bf16.mxu0 %v1580_v0 }
 0x2c0   : > { %1469 = vmatmul.mubr.msk.bf16.gmra.mrb[8].mxu0 %vm1069_vm3, %v1539_v26 }
 0x38b   : > { %v1259_v37 = vpop.f32.mrb[4].mxu0 }
 0x38c   : > { %v1260_v12 = vadd.f32 %v1259_v37, %v1186_v43  ;;  %v1261_v54 = vpop.f32.mrb[5].mxu0 }
 0x38d   : > { %v1262_v53 = vadd.f32 %v1261_v54, %v1186_v43  ;;  %v1263_v25 = vpop.f32.mrb[6].mxu0 }
 0x38e   : > { %v1470_v55 = vmul.f32 -1.442695, %v1260_v12  ;;  %v1264_v27 = vadd.f32 %v1263_v25, %v1191_v61  ;;  %v1265_v56 = vpop.f32.mrb[7].mxu0 }
 0x38f   : > { %v1471_v5 = vmul.f32 -1.442695, %v1262_v53  ;;  %v1266_v28 = vadd.f32 %v1265_v56, %v1191_v61 }
 0x390   : > { %1540 = vpow2.f32 %v1470_v55  ;;  %v1472_v0 = vmul.f32 -1.442695, %v1264_v27 }
 0x391   : > { %1542 = vpow2.f32 %v1471_v5  ;;  %v1473_v57 = vmul.f32 -1.442695, %v1266_v28 }
 0x392   : > { %1544 = vpow2.f32 %v1472_v0 }
 0x393   : > { %1546 = vpow2.f32 %v1473_v57  ;;  %v1269_v29 = vpop.f32.mrb[8].mxu0 }
 0x394   : > { %v1271_v31 = vpop.f32.mrb[9].mxu0  ;;  %v1270_v62 = vadd.f32 %v1269_v29, %v1196_v58 }
 0x395   : > { %v1273_v30 = vpop.f32.mrb[10].mxu0  ;;  %v1272_v63 = vadd.f32 %v1271_v31, %v1196_v58 }
 0x396   : > { %v1274_v33 = vadd.f32 %v1273_v30, %v1201_v59  ;;  %v1275_v1 = vpop.f32.mrb[11].mxu0  ;;  %1548 = vtanh.f32 %v1270_v62 }
 0x397   : > { %v1276_v2 = vadd.f32 %v1275_v1, %v1201_v59  ;;  %1550 = vtanh.f32 %v1272_v63 }
 0x398   : > { %v1474_v35 = vmul.f32 -1.442695, %v1274_v33 }
 0x399   : > { %v1475_v32 = vmul.f32 -1.442695, %v1276_v2 }
 0x39a   : > { %v1541_v44 = vpop.eup %1540  ;;  %1552 = vpow2.f32 %v1474_v35 }
 0x39b   : > { %v1543_v60 = vpop.eup %1542  ;;  %v1284_v3 = vadd.f32 1.0, %v1541_v44  ;;  %1554 = vpow2.f32 %v1475_v32 }
 0x39c   : > { %v1545_v4 = vpop.eup %1544  ;;  %v1285_v7 = vadd.f32 1.0, %v1543_v60 }
 0x39d   : > { %v1547_v8 = vpop.eup %1546  ;;  %1556 = vrcp.f32 %v1284_v3  ;;  %v1300_v9 = vadd.f32 1.0, %v1545_v4 }
 0x39e   : > { %1558 = vrcp.f32 %v1285_v7  ;;  %v1301_v10 = vadd.f32 1.0, %v1547_v8 }
 0x39f   : > { %1560 = vrcp.f32 %v1300_v9 }
 0x3a0   : > { %1562 = vrcp.f32 %v1301_v10  ;;  %v1549_v11 = vpop.eup %1548 }
 0x3a1   : > { %v1551_v48 = vpop.eup %1550 }
 0x3a4   : > { %v1553_v15 = vpop.eup %1552 }
 0x3a5   : > { %v1555_v17 = vpop.eup %1554  ;;  %v1318_v38 = vadd.f32 1.0, %v1553_v15 }
 0x3a6   : > { %v1319_v40 = vadd.f32 1.0, %v1555_v17 }
 0x3a7   : > { %v1557_v19 = vpop.eup %1556  ;;  %1564 = vrcp.f32 %v1318_v38 }
 0x3a8   : > { %v1559_v34 = vpop.eup %1558  ;;  %v1290_v36 = vmul.f32 %v1557_v19, %v1063_v16  ;;  %1566 = vrcp.f32 %v1319_v40 }
 0x3a9   : > { %v1561_v39 = vpop.eup %1560  ;;  %v1291_v13 = vmul.f32 %v1559_v34, %v1064_v18 }
 0x3aa   : > { %v1563_v46 = vpop.eup %1562  ;;  %v1306_v42 = vmul.f32 %v1561_v39, %v1549_v11 }
 0x3ab   : > { %v1307_v20 = vmul.f32 %v1563_v46, %v1551_v48 }
 0x3ac   : > { %v1308_v41 = vadd.f32 %v1306_v42, %v1290_v36 }
 0x3ad   : > { %v1309_v49 = vadd.f32 %v1307_v20, %v1291_v13 }
 0x3ae   : > { %1568 = vtanh.f32 %v1308_v41  ;;  %1328 = vst [vmem:[%s493_s17] sm:$0xff] %v1308_v41 }
 0x3af   : > { %1570 = vtanh.f32 %v1309_v49  ;;  %1329 = vst [vmem:[%s493_s17 + $0x8] sm:$0xff] %v1309_v49 }
 0x3b1   : > { %v1565_v14 = vpop.eup %1564 }
 0x3b2   : > { %v1567_v21 = vpop.eup %1566 }
 0x3b8   : > { %v1569_v45 = vpop.eup %1568 }
 0x3b9   : > { %v1571_v50 = vpop.eup %1570  ;;  %v1324_v6 = vmul.f32 %v1569_v45, %v1565_v14 }
 0x3ba   : > { %v1325_v24 = vmul.f32 %v1571_v50, %v1567_v21 }
 0x3bb   : > { %1326 = vst [vmem:[%s488_s20] sm:$0xff] %v1324_v6 }
 0x3bc   : > { %1327 = vst [vmem:[%s488_s20 + $0x8] sm:$0xff] %v1325_v24 }
 0x3bd PF: > { %s24_s25 = sadd.s32 1, %s1578_s25  }
 0x3be   : > { %p21_p4 = scmp.ge.s32.totalorder %s24_s25, 4  }
 0x3c0   :  { %23 = sbr.rel (!%p21_p4) target bundleno = 1 (0x1), region = 116 }

</bundles_post_ra>
